<compile_context>
chip_gen: v7x
topology: tpu7x:2x2x1
jax: 0.10.0
libtpu: 0.0.40
codegen_flags: <defaults>
</compile_context>

<pallas_src>
import functools
import math

import jax
import jax.numpy as jnp
import numpy as np
from jax.experimental import pallas as pl
from jax.experimental.pallas import tpu as pltpu

_BF16 = jnp.bfloat16
_NEG_INF = -1000000000.0          # same constant as the PyTorch masked_fill
_MIB = 1 << 20


# ----------------------------------------------------------------------------
# Capability probe: single-buffered constant blocks (pl.Buffered(1)).
# Falls back to default double-buffering if this JAX build rejects it, so the
# script always runs cleanly.
# ----------------------------------------------------------------------------
def _probe_kernel(x_ref, o_ref):
    o_ref[...] = x_ref[...]


@functools.lru_cache(maxsize=None)
def _single_buffer_ok():
    try:
        spec = pl.BlockSpec((8, 128), lambda i: (0, 0),
                            pipeline_mode=pl.Buffered(1))
        fn = pl.pallas_call(
            _probe_kernel,
            out_shape=jax.ShapeDtypeStruct((8, 128), jnp.float32),
            grid=(1,),
            in_specs=[spec],
            out_specs=pl.BlockSpec((8, 128), lambda i: (0, 0)),
        )
        jax.block_until_ready(fn(jnp.asarray(np.zeros((8, 128), np.float32))))
        return True
    except Exception:            # noqa: BLE001 — fall back to default buffering
        return False


def _const_spec(shape):
    """BlockSpec for a weight/bias/LN block that is identical for every grid step."""
    zeros = (0,) * len(shape)
    index_map = lambda *_: zeros
    if _single_buffer_ok():
        return pl.BlockSpec(shape, index_map, pipeline_mode=pl.Buffered(1))
    return pl.BlockSpec(shape, index_map)


# ----------------------------------------------------------------------------
# Tile / VMEM helpers
# ----------------------------------------------------------------------------
def _pick_tile(s, target=256):
    """Largest multiple-of-8 tile <= target that divides s, else full s."""
    if s <= target:
        return s
    for t in (target, 128, 64, 32, 16, 8):
        if s % t == 0:
            return t
    return s


def _pick_seq_tile(s, batch, target=256):
    """Seq tile; shrink so batch * n_tiles >= 2 (feed both v7x TensorCores)."""
    t = _pick_tile(s, target)
    while batch * (s // t) < 2 and t >= 16 and s % (t // 2) == 0:
        t //= 2
    return t


def _vmem_limit(footprint_bytes):
    """Per-tile footprint + ~30% headroom, never below the default, cap at v7x."""
    return int(min(64 * _MIB, max(32 * _MIB, int(footprint_bytes * 1.3))))


# ----------------------------------------------------------------------------
# Kernel 1: K/V projection (computed once per sequence, head-major bf16 output)
# ----------------------------------------------------------------------------
def _kv_proj_kernel(kv_ref, wk_ref, bk_ref, wv_ref, bv_ref, ko_ref, vo_ref, *,
                    num_heads):
    kv = kv_ref[0]                                            # (TK, D) bf16
    d_model = kv.shape[-1]
    d_k = d_model // num_heads
    k = jnp.dot(kv, wk_ref[...], preferred_element_type=jnp.float32) + bk_ref[...]
    v = jnp.dot(kv, wv_ref[...], preferred_element_type=jnp.float32) + bv_ref[...]
    for h in range(num_heads):                                # static lane slices
        sl = slice(h * d_k, (h + 1) * d_k)
        ko_ref[0, h] = k[:, sl].astype(ko_ref.dtype)
        vo_ref[0, h] = v[:, sl].astype(vo_ref.dtype)


def kv_project(kv, wk_t, bk, wv_t, bv, num_heads):
    """Head-major K/V projection, computed exactly once per sequence."""
    B, Sk, D = kv.shape
    d_k = D // num_heads
    TK = _pick_seq_tile(Sk, B)
    kern = functools.partial(_kv_proj_kernel, num_heads=num_heads)

    flops = 4 * B * Sk * D * D
    bytes_acc = 3 * B * Sk * D * 2 + 2 * D * D * 2 + 2 * D * 4
    footprint = (2 * TK * D * 2              # kv block (double buffered)
                 + 2 * 2 * D * D * 2         # W_k, W_v
                 + 2 * 2 * 2 * TK * D * 2    # K, V output blocks
                 + 4 * D * 4)

    out_sd = jax.ShapeDtypeStruct((B, num_heads, Sk, d_k), _BF16)
    return pl.pallas_call(
        kern,
        out_shape=(out_sd, out_sd),
        grid=(B, Sk // TK),
        in_specs=[
            pl.BlockSpec((1, TK, D), lambda b, i: (b, i, 0)),        # kv
            _const_spec((D, D)), _const_spec((1, D)),                # W_k, b_k
            _const_spec((D, D)), _const_spec((1, D)),                # W_v, b_v
        ],
        out_specs=(
            pl.BlockSpec((1, num_heads, TK, d_k), lambda b, i: (b, 0, i, 0)),
            pl.BlockSpec((1, num_heads, TK, d_k), lambda b, i: (b, 0, i, 0)),
        ),
        compiler_params=pltpu.CompilerParams(
            dimension_semantics=("parallel", "parallel"),
            vmem_limit_bytes=_vmem_limit(footprint)),
        cost_estimate=pl.CostEstimate(flops=int(flops), transcendentals=0,
                                      bytes_accessed=int(bytes_acc)),
    )(kv, wk_t, bk, wv_t, bv)


# ----------------------------------------------------------------------------
# Kernel 2: flash MHA + output projection + residual add + LayerNorm
# ----------------------------------------------------------------------------
def _mha_flash_norm_kernel(x_ref, k_ref, v_ref, mask_ref, wq_ref, bq_ref,
                           wo_ref, bo_ref, g_ref, beta_ref, o_ref,
                           q_scr, m_scr, l_scr, acc_scr, *, num_heads):
    ki = pl.program_id(2)
    d_model = x_ref.shape[-1]
    d_k = d_model // num_heads

    @pl.when(ki == 0)
    def _init():
        # Q projection once per (batch, q-tile); fold 1/sqrt(d_k) into Q.
        q = jnp.dot(x_ref[0], wq_ref[...], preferred_element_type=jnp.float32)
        q = (q + bq_ref[...]) * (1.0 / math.sqrt(d_k))
        for h in range(num_heads):                     # head-major bf16 scratch
            q_scr[h] = q[:, h * d_k:(h + 1) * d_k].astype(q_scr.dtype)
        m_scr[...] = jnp.full_like(m_scr, -jnp.inf)
        l_scr[...] = jnp.zeros_like(l_scr)
        acc_scr[...] = jnp.zeros_like(acc_scr)

    # Scores for all heads vs. this kv tile (MXU contraction = d_k; keep
    # d_k >= 128 at the model level for full MXU fill on v6e/v7x).
    s = jnp.einsum("hqd,hkd->hqk", q_scr[...], k_ref[0],
                   preferred_element_type=jnp.float32)        # (H, TQ, TK) f32
    bias = jnp.where(mask_ref[0] != 0, 0.0, _NEG_INF)         # int8 mask -> bias
    s = s + bias[None, :, :].astype(jnp.float32)

    # Online (flash) softmax update, all statistics in f32.
    m_prev = m_scr[...]
    m_new = jnp.maximum(m_prev, jnp.max(s, axis=-1, keepdims=True))
    alpha = jnp.exp(m_prev - m_new)
    p = jnp.exp(s - m_new)
    l_scr[...] = alpha * l_scr[...] + jnp.sum(p, axis=-1, keepdims=True)
    acc_scr[...] = alpha * acc_scr[...] + jnp.einsum(
        "hqk,hkd->hqd", p.astype(v_ref.dtype), v_ref[0],
        preferred_element_type=jnp.float32)
    m_scr[...] = m_new

    @pl.when(ki == pl.num_programs(2) - 1)
    def _finalize():
        inv_l = pl.reciprocal(l_scr[...], approx=True)        # (H, TQ, 1)
        # One lane-concat per query tile (not per kv step) so the output
        # projection is a single full-width K = D matmul.
        ctx = jnp.concatenate(
            [acc_scr[h] * inv_l[h] for h in range(num_heads)], axis=-1)
        attn = jnp.dot(ctx.astype(jnp.bfloat16), wo_ref[...],
                       preferred_element_type=jnp.float32) + bo_ref[...]
        # Residual add + LayerNorm in f32 (eps = 1e-5, like nn.LayerNorm).
        z = x_ref[0].astype(jnp.float32) + attn
        mean = jnp.mean(z, axis=-1, keepdims=True)
        var = jnp.mean((z - mean) ** 2, axis=-1, keepdims=True)
        y = (z - mean) * jax.lax.rsqrt(var + 1e-5) * g_ref[...] + beta_ref[...]
        o_ref[0] = y.astype(o_ref.dtype)


def mha_add_norm(x, k_heads, v_heads, mask_i8, wq_t, bq, wo_t, bo, gamma, beta,
                 num_heads):
    """LayerNorm(x + MHA(q=x, K=k_heads, V=v_heads, mask)), flash kv tiling."""
    B, Sq, D = x.shape
    Sk = k_heads.shape[2]
    d_k = D // num_heads
    TQ = _pick_seq_tile(Sq, B)
    TK = _pick_tile(Sk, 256)
    kern = functools.partial(_mha_flash_norm_kernel, num_heads=num_heads)

    flops = 4 * B * Sq * D * D + 4 * B * Sq * Sk * D
    transcend = B * num_heads * Sq * Sk
    bytes_acc = (2 * B * Sq * D * 2 + 2 * B * Sk * D * 2 + B * Sq * Sk
                 + 2 * D * D * 2 + 6 * D * 4)
    lane = 128
    footprint = (
        2 * TQ * D * 2                                   # x block
        + 2 * 2 * num_heads * TK * d_k * 2               # K, V blocks
        + 2 * TQ * TK                                    # int8 mask block
        + 2 * 2 * D * D * 2 + 2 * 6 * D * 4              # W_q, W_o, biases, LN
        + 2 * TQ * D * 2                                 # output block
        + num_heads * TQ * max(d_k, lane) * 2            # Q scratch (bf16)
        + 2 * num_heads * TQ * lane * 4                  # m, l scratch (padded)
        + num_heads * TQ * max(d_k, lane) * 4            # acc scratch
        + 3 * num_heads * TQ * max(TK, lane) * 4         # s / p temporaries
    )
    return pl.pallas_call(
        kern,
        out_shape=jax.ShapeDtypeStruct((B, Sq, D), _BF16),
        grid=(B, Sq // TQ, Sk // TK),
        in_specs=[
            pl.BlockSpec((1, TQ, D), lambda b, i, j: (b, i, 0)),               # x
            pl.BlockSpec((1, num_heads, TK, d_k), lambda b, i, j: (b, 0, j, 0)),
            pl.BlockSpec((1, num_heads, TK, d_k), lambda b, i, j: (b, 0, j, 0)),
            pl.BlockSpec((1, TQ, TK), lambda b, i, j: (b, i, j)),              # mask
            _const_spec((D, D)), _const_spec((1, D)),                          # W_q, b_q
            _const_spec((D, D)), _const_spec((1, D)),                          # W_o, b_o
            _const_spec((1, D)), _const_spec((1, D)),                          # LN g, b
        ],
        out_specs=pl.BlockSpec((1, TQ, D), lambda b, i, j: (b, i, 0)),
        scratch_shapes=[
            pltpu.VMEM((num_heads, TQ, d_k), _BF16),        # Q (head-major)
            pltpu.VMEM((num_heads, TQ, 1), jnp.float32),    # m (running max)
            pltpu.VMEM((num_heads, TQ, 1), jnp.float32),    # l (running denom)
            pltpu.VMEM((num_heads, TQ, d_k), jnp.float32),  # acc (context)
        ],
        compiler_params=pltpu.CompilerParams(
            dimension_semantics=("parallel", "parallel", "arbitrary"),
            vmem_limit_bytes=_vmem_limit(footprint)),
        cost_estimate=pl.CostEstimate(flops=int(flops),
                                      transcendentals=int(transcend),
                                      bytes_accessed=int(bytes_acc)),
    )(x, k_heads, v_heads, mask_i8, wq_t, bq, wo_t, bo, gamma, beta)


# ----------------------------------------------------------------------------
# Kernel 3: FFN (Dff streamed) + residual add + LayerNorm
# ----------------------------------------------------------------------------
def _ffn_norm_kernel(x_ref, w1_ref, b1_ref, w2_ref, b2_ref, g_ref, beta_ref,
                     o_ref, acc_scr):
    f = pl.program_id(2)

    @pl.when(f == 0)
    def _init():
        acc_scr[...] = jnp.zeros_like(acc_scr)

    h = jnp.dot(x_ref[0], w1_ref[...], preferred_element_type=jnp.float32)
    h = jnp.maximum(h + b1_ref[...], 0.0)
    acc_scr[...] += jnp.dot(h.astype(jnp.bfloat16), w2_ref[...],
                            preferred_element_type=jnp.float32)

    @pl.when(f == pl.num_programs(2) - 1)
    def _finalize():
        z = x_ref[0].astype(jnp.float32) + acc_scr[...] + b2_ref[...]
        mean = jnp.mean(z, axis=-1, keepdims=True)
        var = jnp.mean((z - mean) ** 2, axis=-1, keepdims=True)
        y = (z - mean) * jax.lax.rsqrt(var + 1e-5) * g_ref[...] + beta_ref[...]
        o_ref[0] = y.astype(o_ref.dtype)


def ffn_add_norm(x, w1_t, b1, w2_t, b2, gamma, beta):
    """LayerNorm(x + fc2(relu(fc1(x)))) with the hidden dim Dff streamed."""
    B, S, D = x.shape
    Dff = w1_t.shape[1]
    TS = _pick_seq_tile(S, B)
    TF = _pick_tile(Dff, 512)

    flops = 4 * B * S * D * Dff
    bytes_acc = 2 * B * S * D * 2 + 2 * D * Dff * 2 + (Dff + 3 * D) * 4
    footprint = (
        2 * TS * D * 2                     # x block
        + 2 * 2 * D * TF * 2               # W1, W2 chunks (double buffered)
        + 2 * TF * 4 + 2 * 6 * D * 4       # b1 chunk + b2 / gamma / beta
        + 2 * TS * D * 2                   # output block
        + TS * D * 4                       # f32 accumulator scratch
        + 2 * TS * max(TF, 128) * 4        # fc1 activation temporaries
    )
    return pl.pallas_call(
        _ffn_norm_kernel,
        out_shape=jax.ShapeDtypeStruct((B, S, D), _BF16),
        grid=(B, S // TS, Dff // TF),
        in_specs=[
            pl.BlockSpec((1, TS, D), lambda b, i, f: (b, i, 0)),   # x (+resid)
            pl.BlockSpec((D, TF), lambda b, i, f: (0, f)),         # W1 chunk
            pl.BlockSpec((1, TF), lambda b, i, f: (0, f)),         # b1 chunk
            pl.BlockSpec((TF, D), lambda b, i, f: (f, 0)),         # W2 chunk
            _const_spec((1, D)),                                   # b2
            _const_spec((1, D)), _const_spec((1, D)),              # LN gamma, beta
        ],
        out_specs=pl.BlockSpec((1, TS, D), lambda b, i, f: (b, i, 0)),
        scratch_shapes=[pltpu.VMEM((TS, D), jnp.float32)],
        compiler_params=pltpu.CompilerParams(
            dimension_semantics=("parallel", "parallel", "arbitrary"),
            vmem_limit_bytes=_vmem_limit(footprint)),
        cost_estimate=pl.CostEstimate(flops=int(flops), transcendentals=0,
                                      bytes_accessed=int(bytes_acc)),
    )(x, w1_t, b1, w2_t, b2, gamma, beta)


# ----------------------------------------------------------------------------
# DecoderLayer forward (dropout == identity, eval semantics)
# ----------------------------------------------------------------------------
def prepare_params(params):
    """Cast matmul weights to bf16 ONCE (outside the per-step hot path)."""
    prepared = {}
    for k, v in params.items():
        if k.endswith(("wq", "wk", "wv", "wo")) or k in ("ff_w1", "ff_w2"):
            prepared[k] = jnp.asarray(v, _BF16)
        else:
            prepared[k] = jnp.asarray(v, jnp.float32)
    return prepared


def decoder_layer_forward(params, x, enc_out, src_mask, tgt_mask, num_heads):
    p = params
    x = x.astype(_BF16)
    enc_out = enc_out.astype(_BF16)
    tgt_mask_i8 = (tgt_mask != 0).astype(jnp.int8)
    src_mask_i8 = (src_mask != 0).astype(jnp.int8)

    # self attention + residual + norm1 (K/V projected once, flash attention)
    k_sa, v_sa = kv_project(x, p["sa_wk"], p["sa_bk"], p["sa_wv"], p["sa_bv"],
                            num_heads)
    x = mha_add_norm(x, k_sa, v_sa, tgt_mask_i8,
                     p["sa_wq"], p["sa_bq"], p["sa_wo"], p["sa_bo"],
                     p["ln1_g"], p["ln1_b"], num_heads)

    # cross attention + residual + norm2
    k_ca, v_ca = kv_project(enc_out, p["ca_wk"], p["ca_bk"], p["ca_wv"],
                            p["ca_bv"], num_heads)
    x = mha_add_norm(x, k_ca, v_ca, src_mask_i8,
                     p["ca_wq"], p["ca_bq"], p["ca_wo"], p["ca_bo"],
                     p["ln2_g"], p["ln2_b"], num_heads)

    # feed forward + residual + norm3
    return ffn_add_norm(x, p["ff_w1"], p["ff_b1"], p["ff_w2"], p["ff_b2"],
                        p["ln3_g"], p["ln3_b"])


# ----------------------------------------------------------------------------
# Pure-JAX f32 reference (mirrors the PyTorch math) for a correctness check
# ----------------------------------------------------------------------------
def _ref_mha(x, kv, mask, wq, bq, wk, bk, wv, bv, wo, bo, num_heads):
    B, Sq, D = x.shape
    Sk = kv.shape[1]
    dk = D // num_heads
    q = (x @ wq + bq).reshape(B, Sq, num_heads, dk).transpose(0, 2, 1, 3)
    k = (kv @ wk + bk).reshape(B, Sk, num_heads, dk).transpose(0, 2, 1, 3)
    v = (kv @ wv + bv).reshape(B, Sk, num_heads, dk).transpose(0, 2, 1, 3)
    s = jnp.einsum("bhqd,bhkd->bhqk", q, k) / math.sqrt(dk)
    s = jnp.where(mask[:, None, :, :] == 0.0, _NEG_INF, s)
    p = jax.nn.softmax(s, axis=-1)
    ctx = jnp.einsum("bhqk,bhkd->bhqd", p, v).transpose(0, 2, 1, 3).reshape(B, Sq, D)
    return ctx @ wo + bo


def _ref_norm(z, g, b):
    m = jnp.mean(z, -1, keepdims=True)
    v = jnp.mean((z - m) ** 2, -1, keepdims=True)
    return (z - m) / jnp.sqrt(v + 1e-5) * g + b


def _ref_forward(p, x, enc_out, src_mask, tgt_mask, num_heads):
    sa = _ref_mha(x, x, tgt_mask, p["sa_wq"], p["sa_bq"], p["sa_wk"], p["sa_bk"],
                  p["sa_wv"], p["sa_bv"], p["sa_wo"], p["sa_bo"], num_heads)
    x = _ref_norm(x + sa, p["ln1_g"], p["ln1_b"])
    ca = _ref_mha(x, enc_out, src_mask, p["ca_wq"], p["ca_bq"], p["ca_wk"],
                  p["ca_bk"], p["ca_wv"], p["ca_bv"], p["ca_wo"], p["ca_bo"],
                  num_heads)
    x = _ref_norm(x + ca, p["ln2_g"], p["ln2_b"])
    h = jnp.maximum(x @ p["ff_w1"] + p["ff_b1"], 0.0)
    ff = h @ p["ff_w2"] + p["ff_b2"]
    return _ref_norm(x + ff, p["ln3_g"], p["ln3_b"])


# ----------------------------------------------------------------------------
if __name__ == "__main__":
    B, S_tgt, S_src = 2, 8, 8
    D, H, DFF = 32, 4, 64

    key = jax.random.PRNGKey(0)
    keys = jax.random.split(key, 24)
    ki = iter(keys)

    def w(shape, k):
        return (jax.random.normal(k, shape, jnp.float32) * 0.05).astype(jnp.float32)

    params = {}
    # attention weights stored pre-transposed: (d_in, d_out); biases as (1, d_out)
    for pfx in ("sa", "ca"):
        for name in ("wq", "wk", "wv", "wo"):
            params[f"{pfx}_{name}"] = w((D, D), next(ki))
        for name in ("bq", "bk", "bv", "bo"):
            params[f"{pfx}_{name}"] = w((1, D), next(ki))
    params["ff_w1"] = w((D, DFF), next(ki))
    params["ff_b1"] = w((1, DFF), next(ki))
    params["ff_w2"] = w((DFF, D), next(ki))
    params["ff_b2"] = w((1, D), next(ki))
    for i in (1, 2, 3):
        params[f"ln{i}_g"] = jnp.ones((1, D), jnp.float32)
        params[f"ln{i}_b"] = jnp.zeros((1, D), jnp.float32)

    kx, ke = jax.random.split(jax.random.PRNGKey(1))
    x = jax.random.normal(kx, (B, S_tgt, D), jnp.float32)
    enc_out = jax.random.normal(ke, (B, S_src, D), jnp.float32)

    # tgt_mask: causal; src_mask: all ones. 0 => masked (PyTorch convention).
    tgt_mask = jnp.broadcast_to(
        jnp.tril(jnp.ones((S_tgt, S_tgt), jnp.float32)), (B, S_tgt, S_tgt))
    src_mask = jnp.ones((B, S_tgt, S_src), jnp.float32)

    prepared = prepare_params(params)
    out = decoder_layer_forward(prepared, x, enc_out, src_mask, tgt_mask, H)
    out = jax.block_until_ready(out)

    # Reference is pure f32 (exact PyTorch semantics); the kernel path uses
    # bf16 matmuls + bf16 activation I/O with f32 residual/softmax/LN math,
    # so compare with a bf16-appropriate tolerance.
    ref = _ref_forward(params, x, enc_out, src_mask, tgt_mask, H)
    np.testing.assert_allclose(np.asarray(out.astype(jnp.float32)),
                               np.asarray(ref), atol=5e-2, rtol=5e-2)

    print("KERNEL_OK")
</pallas_src>

<mosaic_0001>
module attributes {stable_mosaic.version = 11 : i64} {
  func.func @_probe_kernel(%arg0: i32, %arg1: memref<8x128xf32, #tpu.memory_space<vmem>>, %arg2: memref<8x128xf32, #tpu.memory_space<vmem>>) attributes {dimension_semantics = [#tpu.dimension_semantics<arbitrary>], iteration_bounds = array<i64: 1>, scalar_prefetch = 0 : i64, scratch_operands = 0 : i64, tpu.core_type = #tpu.core_type<tc>, window_params = [{pipeline_mode = #tpu.pipeline_mode<synchronous>, transform_indices = @transform_0, window_bounds = array<i64: 8, 128>}, {pipeline_mode = #tpu.pipeline_mode<synchronous>, transform_indices = @transform_1, window_bounds = array<i64: 8, 128>}]} {
    %c0 = arith.constant 0 : index
    %c0_0 = arith.constant 0 : index
    %0 = vector.load %arg1[%c0, %c0_0] : memref<8x128xf32, #tpu.memory_space<vmem>>, vector<8x128xf32>
    %c0_1 = arith.constant 0 : index
    %c0_2 = arith.constant 0 : index
    %1 = vector.load %arg2[%c0_1, %c0_2] : memref<8x128xf32, #tpu.memory_space<vmem>>, vector<8x128xf32>
    tpu.vector_store %arg2[%c0_1, %c0_2], %0 {strides = array<i32>} : memref<8x128xf32, #tpu.memory_space<vmem>>, vector<8x128xf32>,
    return
  }
  func.func @transform_0(%arg0: i32) -> (i32, i32) {
    %c0_i32 = arith.constant 0 : i32
    %c0_i32_0 = arith.constant 0 : i32
    %c0_i32_1 = arith.constant 0 : i32
    return %c0_i32, %c0_i32_0 : i32, i32
  }
  func.func @transform_1(%arg0: i32) -> (i32, i32) {
    %c0_i32 = arith.constant 0 : i32
    %c0_i32_0 = arith.constant 0 : i32
    %c0_i32_1 = arith.constant 0 : i32
    return %c0_i32, %c0_i32_0 : i32, i32
  }
}

module attributes {stable_mosaic.version = 11 : i64} {
  func.func @_kv_proj_kernel(%arg0: i32, %arg1: i32, %arg2: memref<1x8x32xbf16, #tpu.memory_space<vmem>>, %arg3: memref<32x32xbf16, #tpu.memory_space<vmem>>, %arg4: memref<1x32xf32, #tpu.memory_space<vmem>>, %arg5: memref<32x32xbf16, #tpu.memory_space<vmem>>, %arg6: memref<1x32xf32, #tpu.memory_space<vmem>>, %arg7: memref<1x4x8x8xbf16, #tpu.memory_space<vmem>>, %arg8: memref<1x4x8x8xbf16, #tpu.memory_space<vmem>>) attributes {dimension_semantics = [#tpu.dimension_semantics<parallel>, #tpu.dimension_semantics<parallel>], iteration_bounds = array<i64: 2, 1>, scalar_prefetch = 0 : i64, scratch_operands = 0 : i64, tpu.core_type = #tpu.core_type<tc>, window_params = [{transform_indices = @transform_0, window_bounds = array<i64: 1, 8, 32>}, {pipeline_mode = #tpu.pipeline_mode<synchronous>, transform_indices = @transform_1, window_bounds = array<i64: 32, 32>}, {pipeline_mode = #tpu.pipeline_mode<synchronous>, transform_indices = @transform_2, window_bounds = array<i64: 1, 32>}, {pipeline_mode = #tpu.pipeline_mode<synchronous>, transform_indices = @transform_3, window_bounds = array<i64: 32, 32>}, {pipeline_mode = #tpu.pipeline_mode<synchronous>, transform_indices = @transform_4, window_bounds = array<i64: 1, 32>}, {transform_indices = @transform_5, window_bounds = array<i64: 1, 4, 8, 8>}, {transform_indices = @transform_6, window_bounds = array<i64: 1, 4, 8, 8>}]} {
    %c0 = arith.constant 0 : index
    %c0_0 = arith.constant 0 : index
    %c0_1 = arith.constant 0 : index
    %0 = vector.load %arg2[%c0, %c0_0, %c0_1] : memref<1x8x32xbf16, #tpu.memory_space<vmem>>, vector<1x8x32xbf16>
    %1 = vector.shape_cast %0 : vector<1x8x32xbf16> to vector<8x32xbf16>
    %c0_2 = arith.constant 0 : index
    %c0_3 = arith.constant 0 : index
    %2 = vector.load %arg3[%c0_2, %c0_3] : memref<32x32xbf16, #tpu.memory_space<vmem>>, vector<32x32xbf16>
    %cst = arith.constant dense<0.000000e+00> : vector<8x32xf32>
    %3 = tpu.matmul %1, %2, %cst {dimension_numbers = #tpu.dot_dimension_numbers<[1], [0], [0], [1], [0, 0, 1, 1], [], []>} : vector<8x32xbf16>, vector<32x32xbf16>, vector<8x32xf32> -> vector<8x32xf32>
    %c0_4 = arith.constant 0 : index
    %c0_5 = arith.constant 0 : index
    %4 = vector.load %arg4[%c0_4, %c0_5] : memref<1x32xf32, #tpu.memory_space<vmem>>, vector<1x32xf32>
    %5 = vector.broadcast %4 : vector<1x32xf32> to vector<8x32xf32>
    %6 = arith.addf %3, %5 : vector<8x32xf32>
    %c0_6 = arith.constant 0 : index
    %c0_7 = arith.constant 0 : index
    %7 = vector.load %arg5[%c0_6, %c0_7] : memref<32x32xbf16, #tpu.memory_space<vmem>>, vector<32x32xbf16>
    %cst_8 = arith.constant dense<0.000000e+00> : vector<8x32xf32>
    %8 = tpu.matmul %1, %7, %cst_8 {dimension_numbers = #tpu.dot_dimension_numbers<[1], [0], [0], [1], [0, 0, 1, 1], [], []>} : vector<8x32xbf16>, vector<32x32xbf16>, vector<8x32xf32> -> vector<8x32xf32>
    %c0_9 = arith.constant 0 : index
    %c0_10 = arith.constant 0 : index
    %9 = vector.load %arg6[%c0_9, %c0_10] : memref<1x32xf32, #tpu.memory_space<vmem>>, vector<1x32xf32>
    %10 = vector.broadcast %9 : vector<1x32xf32> to vector<8x32xf32>
    %11 = arith.addf %8, %10 : vector<8x32xf32>
    %12 = vector.extract_strided_slice %6 {offsets = [0, 0], sizes = [8, 8], strides = [1, 1]} : vector<8x32xf32> to vector<8x8xf32>
    %13 = arith.truncf %12 : vector<8x8xf32> to vector<8x8xbf16>
    %c0_11 = arith.constant 0 : index
    %c0_12 = arith.constant 0 : index
    %c0_13 = arith.constant 0 : index
    %c0_14 = arith.constant 0 : index
    %14 = vector.load %arg7[%c0_11, %c0_12, %c0_13, %c0_14] : memref<1x4x8x8xbf16, #tpu.memory_space<vmem>>, vector<1x1x8x8xbf16>
    %15 = vector.shape_cast %14 : vector<1x1x8x8xbf16> to vector<8x8xbf16>
    %16 = vector.shape_cast %13 : vector<8x8xbf16> to vector<1x1x8x8xbf16>
    tpu.vector_store %arg7[%c0_11, %c0_12, %c0_13, %c0_14], %16 {strides = array<i32>} : memref<1x4x8x8xbf16, #tpu.memory_space<vmem>>, vector<1x1x8x8xbf16>,
    %17 = vector.extract_strided_slice %11 {offsets = [0, 0], sizes = [8, 8], strides = [1, 1]} : vector<8x32xf32> to vector<8x8xf32>
    %18 = arith.truncf %17 : vector<8x8xf32> to vector<8x8xbf16>
    %c0_15 = arith.constant 0 : index
    %c0_16 = arith.constant 0 : index
    %c0_17 = arith.constant 0 : index
    %c0_18 = arith.constant 0 : index
    %19 = vector.load %arg8[%c0_15, %c0_16, %c0_17, %c0_18] : memref<1x4x8x8xbf16, #tpu.memory_space<vmem>>, vector<1x1x8x8xbf16>
    %20 = vector.shape_cast %19 : vector<1x1x8x8xbf16> to vector<8x8xbf16>
    %21 = vector.shape_cast %18 : vector<8x8xbf16> to vector<1x1x8x8xbf16>
    tpu.vector_store %arg8[%c0_15, %c0_16, %c0_17, %c0_18], %21 {strides = array<i32>} : memref<1x4x8x8xbf16, #tpu.memory_space<vmem>>, vector<1x1x8x8xbf16>,
    %22 = vector.extract_strided_slice %6 {offsets = [0, 8], sizes = [8, 8], strides = [1, 1]} : vector<8x32xf32> to vector<8x8xf32>
    %23 = arith.truncf %22 : vector<8x8xf32> to vector<8x8xbf16>
    %c0_19 = arith.constant 0 : index
    %c1 = arith.constant 1 : index
    %c0_20 = arith.constant 0 : index
    %c0_21 = arith.constant 0 : index
    %24 = vector.load %arg7[%c0_19, %c1, %c0_20, %c0_21] : memref<1x4x8x8xbf16, #tpu.memory_space<vmem>>, vector<1x1x8x8xbf16>
    %25 = vector.shape_cast %24 : vector<1x1x8x8xbf16> to vector<8x8xbf16>
    %26 = vector.shape_cast %23 : vector<8x8xbf16> to vector<1x1x8x8xbf16>
    tpu.vector_store %arg7[%c0_19, %c1, %c0_20, %c0_21], %26 {strides = array<i32>} : memref<1x4x8x8xbf16, #tpu.memory_space<vmem>>, vector<1x1x8x8xbf16>,
    %27 = vector.extract_strided_slice %11 {offsets = [0, 8], sizes = [8, 8], strides = [1, 1]} : vector<8x32xf32> to vector<8x8xf32>
    %28 = arith.truncf %27 : vector<8x8xf32> to vector<8x8xbf16>
    %c0_22 = arith.constant 0 : index
    %c1_23 = arith.constant 1 : index
    %c0_24 = arith.constant 0 : index
    %c0_25 = arith.constant 0 : index
    %29 = vector.load %arg8[%c0_22, %c1_23, %c0_24, %c0_25] : memref<1x4x8x8xbf16, #tpu.memory_space<vmem>>, vector<1x1x8x8xbf16>
    %30 = vector.shape_cast %29 : vector<1x1x8x8xbf16> to vector<8x8xbf16>
    %31 = vector.shape_cast %28 : vector<8x8xbf16> to vector<1x1x8x8xbf16>
    tpu.vector_store %arg8[%c0_22, %c1_23, %c0_24, %c0_25], %31 {strides = array<i32>} : memref<1x4x8x8xbf16, #tpu.memory_space<vmem>>, vector<1x1x8x8xbf16>,
    %32 = vector.extract_strided_slice %6 {offsets = [0, 16], sizes = [8, 8], strides = [1, 1]} : vector<8x32xf32> to vector<8x8xf32>
    %33 = arith.truncf %32 : vector<8x8xf32> to vector<8x8xbf16>
    %c0_26 = arith.constant 0 : index
    %c2 = arith.constant 2 : index
    %c0_27 = arith.constant 0 : index
    %c0_28 = arith.constant 0 : index
    %34 = vector.load %arg7[%c0_26, %c2, %c0_27, %c0_28] : memref<1x4x8x8xbf16, #tpu.memory_space<vmem>>, vector<1x1x8x8xbf16>
    %35 = vector.shape_cast %34 : vector<1x1x8x8xbf16> to vector<8x8xbf16>
    %36 = vector.shape_cast %33 : vector<8x8xbf16> to vector<1x1x8x8xbf16>
    tpu.vector_store %arg7[%c0_26, %c2, %c0_27, %c0_28], %36 {strides = array<i32>} : memref<1x4x8x8xbf16, #tpu.memory_space<vmem>>, vector<1x1x8x8xbf16>,
    %37 = vector.extract_strided_slice %11 {offsets = [0, 16], sizes = [8, 8], strides = [1, 1]} : vector<8x32xf32> to vector<8x8xf32>
    %38 = arith.truncf %37 : vector<8x8xf32> to vector<8x8xbf16>
    %c0_29 = arith.constant 0 : index
    %c2_30 = arith.constant 2 : index
    %c0_31 = arith.constant 0 : index
    %c0_32 = arith.constant 0 : index
    %39 = vector.load %arg8[%c0_29, %c2_30, %c0_31, %c0_32] : memref<1x4x8x8xbf16, #tpu.memory_space<vmem>>, vector<1x1x8x8xbf16>
    %40 = vector.shape_cast %39 : vector<1x1x8x8xbf16> to vector<8x8xbf16>
    %41 = vector.shape_cast %38 : vector<8x8xbf16> to vector<1x1x8x8xbf16>
    tpu.vector_store %arg8[%c0_29, %c2_30, %c0_31, %c0_32], %41 {strides = array<i32>} : memref<1x4x8x8xbf16, #tpu.memory_space<vmem>>, vector<1x1x8x8xbf16>,
    %42 = vector.extract_strided_slice %6 {offsets = [0, 24], sizes = [8, 8], strides = [1, 1]} : vector<8x32xf32> to vector<8x8xf32>
    %43 = arith.truncf %42 : vector<8x8xf32> to vector<8x8xbf16>
    %c0_33 = arith.constant 0 : index
    %c3 = arith.constant 3 : index
    %c0_34 = arith.constant 0 : index
    %c0_35 = arith.constant 0 : index
    %44 = vector.load %arg7[%c0_33, %c3, %c0_34, %c0_35] : memref<1x4x8x8xbf16, #tpu.memory_space<vmem>>, vector<1x1x8x8xbf16>
    %45 = vector.shape_cast %44 : vector<1x1x8x8xbf16> to vector<8x8xbf16>
    %46 = vector.shape_cast %43 : vector<8x8xbf16> to vector<1x1x8x8xbf16>
    tpu.vector_store %arg7[%c0_33, %c3, %c0_34, %c0_35], %46 {strides = array<i32>} : memref<1x4x8x8xbf16, #tpu.memory_space<vmem>>, vector<1x1x8x8xbf16>,
    %47 = vector.extract_strided_slice %11 {offsets = [0, 24], sizes = [8, 8], strides = [1, 1]} : vector<8x32xf32> to vector<8x8xf32>
    %48 = arith.truncf %47 : vector<8x8xf32> to vector<8x8xbf16>
    %c0_36 = arith.constant 0 : index
    %c3_37 = arith.constant 3 : index
    %c0_38 = arith.constant 0 : index
    %c0_39 = arith.constant 0 : index
    %49 = vector.load %arg8[%c0_36, %c3_37, %c0_38, %c0_39] : memref<1x4x8x8xbf16, #tpu.memory_space<vmem>>, vector<1x1x8x8xbf16>
    %50 = vector.shape_cast %49 : vector<1x1x8x8xbf16> to vector<8x8xbf16>
    %51 = vector.shape_cast %48 : vector<8x8xbf16> to vector<1x1x8x8xbf16>
    tpu.vector_store %arg8[%c0_36, %c3_37, %c0_38, %c0_39], %51 {strides = array<i32>} : memref<1x4x8x8xbf16, #tpu.memory_space<vmem>>, vector<1x1x8x8xbf16>,
    return
  }
  func.func @transform_0(%arg0: i32, %arg1: i32) -> (i32, i32, i32) {
    %c0_i32 = arith.constant 0 : i32
    %c0_i32_0 = arith.constant 0 : i32
    return %arg0, %arg1, %c0_i32 : i32, i32, i32
  }
  func.func @transform_1(%arg0: i32, %arg1: i32) -> (i32, i32) {
    %c0_i32 = arith.constant 0 : i32
    %c0_i32_0 = arith.constant 0 : i32
    %c0_i32_1 = arith.constant 0 : i32
    return %c0_i32, %c0_i32_0 : i32, i32
  }
  func.func @transform_2(%arg0: i32, %arg1: i32) -> (i32, i32) {
    %c0_i32 = arith.constant 0 : i32
    %c0_i32_0 = arith.constant 0 : i32
    %c0_i32_1 = arith.constant 0 : i32
    return %c0_i32, %c0_i32_0 : i32, i32
  }
  func.func @transform_3(%arg0: i32, %arg1: i32) -> (i32, i32) {
    %c0_i32 = arith.constant 0 : i32
    %c0_i32_0 = arith.constant 0 : i32
    %c0_i32_1 = arith.constant 0 : i32
    return %c0_i32, %c0_i32_0 : i32, i32
  }
  func.func @transform_4(%arg0: i32, %arg1: i32) -> (i32, i32) {
    %c0_i32 = arith.constant 0 : i32
    %c0_i32_0 = arith.constant 0 : i32
    %c0_i32_1 = arith.constant 0 : i32
    return %c0_i32, %c0_i32_0 : i32, i32
  }
  func.func @transform_5(%arg0: i32, %arg1: i32) -> (i32, i32, i32, i32) {
    %c0_i32 = arith.constant 0 : i32
    %c0_i32_0 = arith.constant 0 : i32
    %c0_i32_1 = arith.constant 0 : i32
    return %arg0, %c0_i32, %arg1, %c0_i32_0 : i32, i32, i32, i32
  }
  func.func @transform_6(%arg0: i32, %arg1: i32) -> (i32, i32, i32, i32) {
    %c0_i32 = arith.constant 0 : i32
    %c0_i32_0 = arith.constant 0 : i32
    %c0_i32_1 = arith.constant 0 : i32
    return %arg0, %c0_i32, %arg1, %c0_i32_0 : i32, i32, i32, i32
  }
}

</mosaic_0001>

<bundles_post_ra>
// kernel: tpu_custom_call.1
= control target key start
LH: loop header
LB: loop body
LE: loop exit
PB: predicated region body
PF: predicated region fallthrough
CT: control target
= control target key end

     0   :  { %6 = vsyncpa [#allocation3], 0  ;;  %s124_s0 = inlined_call_operand.hbm [shape: f32[8,128], index: 0, kind: input, shape index: {}]   ;;  %s125_s1 = inlined_call_operand.hbm [shape: f32[8,128], index: 1, kind: output, shape index: {}]  }
   0x1   :  { %7 = vsyncpa [#allocation4], 0  ;;  %s88_s6 = smov [#allocation2]   ;;  %s40_s10 = scalar_lea.hbm %s124_s0, 128 }
   0x2   :  { %s14_s7 = sshll.u32 %s88_s6, 4  ;;  %p41_p0 = scmp.ne.s32.totalorder %s124_s0, %s40_s10  ;;  %s15_s7 = int_to_ptr.vmem [resolvable:$true] %s14_s7 }
   0x3   :  { %p44_p1 = scmp.lt.u32.totalorder %s40_s10, %s124_s0 }
   0x5   :  { %p46_p2 = pnand %p44_p1, %p41_p0 }
   0x7   :  { %49 = shalt.err (!%p46_p2)
}
   0x8   :  { %s50_s15 = scalar_lea.vmem %s15_s7, 128  ;;  %p55_p4 = scmp.lt.s32.totalorder %s15_s7, %s15_s7 }
   0x9   :  { %p51_p3 = scmp.ne.s32.totalorder %s15_s7, %s50_s15  ;;  %p56_p5 = scmp.lt.s32.totalorder %s50_s15, %s50_s15 }
   0xb   :  { %p57_p6 = por %p56_p5, %p55_p4 }
   0xd   :  { %p58_p7 = pnand %p57_p6, %p51_p3 }
   0xf   :  { %61 = shalt.err (!%p58_p7)
}
  0x10   :  { %17 = dma.hbm_to_vmem [thread:$0]  %s124_s0, 128, %s15_s7, [#allocation3]  }
  0x11   :  { %84 = dma.done.wait [#allocation3], 128  }
  0x12   :  { %85 = vsyncadd [#allocation3], 4294967168  ;;  %s89_s18 = smov [#allocation5]   ;;  %v21_v0 = vld [vmem:[#allocation2] sm:$0xff] }
  0x13   :  { %s29_s19 = sshll.u32 %s89_s18, 4  ;;  %22 = vst [vmem:[#allocation5] sm:$0xff] %v21_v0  ;;  %s30_s19 = int_to_ptr.vmem [resolvable:$true] %s29_s19 }
  0x14   :  { %s62_s20 = scalar_lea.vmem %s30_s19, 128  ;;  %p67_p9 = scmp.lt.s32.totalorder %s30_s19, %s30_s19 }
  0x15   :  { %p63_p8 = scmp.ne.s32.totalorder %s30_s19, %s62_s20  ;;  %p68_p10 = scmp.lt.s32.totalorder %s62_s20, %s62_s20 }
  0x17   :  { %p69_p11 = por %p68_p10, %p67_p9 }
  0x19   :  { %p70_p12 = pnand %p69_p11, %p63_p8 }
  0x1b   :  { %73 = shalt.err (!%p70_p12)
}
  0x1c   :  { %s74_s23 = scalar_lea.hbm %s125_s1, 128 }
  0x1d   :  { %p75_p13 = scmp.ne.s32.totalorder %s125_s1, %s74_s23  ;;  %p78_p0 = scmp.lt.u32.totalorder %s74_s23, %s125_s1 }
  0x1f   :  { %p80_p1 = pnand %p78_p0, %p75_p13 }
  0x21   :  { %83 = shalt.err (!%p80_p1)
}
  0x22   :  { %32 = dma.vmem_to_hbm [thread:$0]  %s30_s19, 128, %s125_s1, [#allocation4]  }
  0x23   :  { %86 = dma.done.wait [#allocation4], 128  }
  0x24   :  { %87 = vsyncadd [#allocation4], 4294967168 }
  0x25   :  { %36 = vsyncpa [#allocation3], 1 }
  0x26   :  { %37 = vsyncpa [#allocation4], 1 }

// kernel: tpu_custom_call.1
= control target key start
LH: loop header
LB: loop body
LE: loop exit
PB: predicated region body
PF: predicated region fallthrough
CT: control target
= control target key end

     0   :  { %12 = vsyncpa [#allocation3], 0  ;;  %s1404_s0 = inlined_call_operand.hbm [shape: bf16[2,8,32], index: 0, kind: input, shape index: {}]   ;;  %s1405_s1 = inlined_call_operand.hbm [shape: bf16[32,32], index: 1, kind: input, shape index: {}]   ;;  %s1406_s2 = inlined_call_operand.vmem [shape: f32[1,32], index: 2, kind: input, shape index: {}]   ;;  %s1407_s3 = inlined_call_operand.hbm [shape: bf16[32,32], index: 3, kind: input, shape index: {}]   ;;  %s1408_s4 = inlined_call_operand.vmem [shape: f32[1,32], index: 4, kind: input, shape index: {}]   ;;  %s1409_s5 = inlined_call_operand.hbm [shape: bf16[2,4,8,8], index: 5, kind: output, shape index: {0}]   ;;  %s1410_s6 = inlined_call_operand.hbm [shape: bf16[2,4,8,8], index: 6, kind: output, shape index: {1}]  }
   0x1   :  { %14 = vsyncpa [#allocation3 + $0x1], 0 }
   0x2   :  { %15 = vsyncpa [#allocation6], 0 }
   0x3   :  { %16 = vsyncpa [#allocation4], 0 }
   0x4   :  { %18 = vsyncpa [#allocation4 + $0x1], 0 }
   0x5   :  { %19 = vsyncpa [#allocation10], 0 }
   0x6   :  { %21 = vsyncpa [#allocation10 + $0x1], 0  ;;  %s1093_s21 = smov 0   ;;  %s1095_s22 = smov 0  }
   0x7   :  { %s1097_s23 = smov 0   ;;  %s1099_s24 = smov 0  }
   0x8   :  { %s1101_s25 = smov 0   ;;  %s1103_s26 = smov 0  }
   0x9 LB: > { %s673_s27 = sadd.s32 4294967295, %s1042_s26   ;;  %s674_s28 = sadd.s32 4294967294, %s1042_s26   ;;  %s1042_s26 = sphi %s1103_s26, %s27_s26   ;;  %s1038_s25 = sphi %s1101_s25, %s1435_s25   ;;  %s1034_s24 = sphi %s1099_s24, %s1434_s24   ;;  %s1030_s23 = sphi %s1097_s23, %s1433_s23   ;;  %s1026_s22 = sphi %s1095_s22, %s1432_s22   ;;  %s1022_s21 = sphi %s1093_s21, %s1431_s21  }
   0xa   : > { %p61_p0 = scmp.ne.s32.totalorder %s1026_s22, %s1022_s21  ;;  %p1127_p1 = scmp.eq.s32.totalorder %s673_s27, 0 }
   0xb   : > { %p1131_p2 = scmp.eq.s32.totalorder %s673_s27, 1  ;;  %p177_p3 = scmp.eq.s32.totalorder %s674_s28, 1 }
   0xc   : > { %s1416_s29 = scalar_select %p1127_p1, 1, 0 }
   0xd   : > { %p1137_p4 = por %p1127_p1, %p61_p0  ;;  %p675_p5 = scmp.ge.s32.totalorder %s1042_s26, 1 }
   0xe   : > { %p1142_p6 = por %p177_p3, %p61_p0  ;;  %p212_p7 = scmp.lt.s32.totalorder %s1042_s26, 3 }
   0xf   : > { %s1418_s7 = scalar_select %p1137_p4, 1, 0 }
  0x10   : > { %s1419_s8 = scalar_select %p1142_p6, 1, 0 }
  0x11   : > { %p1147_p8 = pnand %p675_p5, %p212_p7  ;;  %s1044_s10 = smov [#allocation5]  }
  0x12   : > { %1420 = sst [smem:[#allocation15_spill]] %s1419_s8  ;;  %s224_s11 = sshll.u32 %s1044_s10, 4  ;;  %s1151_s11 = int_to_ptr.vmem [resolvable:$true] %s224_s11 }
  0x13   : > { %p751_p9 = pneg %p1147_p8  ;;  %s1045_s13 = smov [#allocation7]  }
  0x14   : > { %s240_s14 = sshll.u32 %s1045_s13, 4  ;;  %s838_s17 = scalar_lea.hbm %s1405_s1, 256  ;;  %s1162_s14 = int_to_ptr.vmem [resolvable:$true] %s240_s14 }
  0x15   : > { %p1158_p11 = pnand %p751_p9, %p1127_p1  ;;  %p839_p12 = scmp.ne.s32.totalorder %s1405_s1, %s838_s17 }
  0x16   : > { %p845_p5 = scmp.lt.u32.totalorder %s838_s17, %s1405_s1 }
  0x17   : > { %p840_p13 = pneg %p1158_p11 }
  0x19   : > { %p841_p0 = pnand %p840_p13, %p839_p12 }
  0x1b   : > { %p842_p3 = pneg %p841_p0 }
  0x1d   : > { %p847_p7 = pnand %p845_p5, %p842_p3 }
  0x1f   : > { %850 = shalt.err (!%p847_p7)
}
  0x20   : > { %s851_s28 = scalar_lea.vmem %s1151_s11, 256  ;;  %p859_p1 = scmp.lt.s32.totalorder %s1151_s11, %s1151_s11 }
  0x21   : > { %p852_p9 = scmp.ne.s32.totalorder %s1151_s11, %s851_s28  ;;  %p860_p12 = scmp.lt.s32.totalorder %s851_s28, %s851_s28 }
  0x23   : > { %p854_p10 = pnand %p852_p9, %p840_p13  ;;  %p861_p0 = por %p860_p12, %p859_p1 }
  0x25   : > { %p855_p6 = pneg %p854_p10 }
  0x27   : > { %p862_p4 = pnand %p861_p0, %p855_p6 }
  0x29   : > { %865 = shalt.err (!%p862_p4)
}
  0x2a   : > { %s1046_s10 = smov 64   ;;  %s1047_s13 = smov 4  }
  0x2b   : > { %754 = dma.hbm_to_vmem [thread:$0]  (!%p1158_p11), %s1405_s1, 256, %s1151_s11, [#allocation6], %s1046_s10, %s1046_s10, %s1047_s13  }
  0x2c   : > { %s866_s19 = scalar_lea.hbm %s1407_s3, 256 }
  0x2d   : > { %p867_p1 = scmp.ne.s32.totalorder %s1407_s3, %s866_s19  ;;  %p873_p10 = scmp.lt.u32.totalorder %s866_s19, %s1407_s3 }
  0x2f   : > { %p869_p4 = pnand %p867_p1, %p840_p13 }
  0x31   : > { %p870_p6 = pneg %p869_p4 }
  0x33   : > { %p875_p3 = pnand %p873_p10, %p870_p6 }
  0x35   : > { %878 = shalt.err (!%p875_p3)
}
  0x36   : > { %s879_s11 = scalar_lea.vmem %s1162_s14, 256  ;;  %p887_p12 = scmp.lt.s32.totalorder %s1162_s14, %s1162_s14 }
  0x37   : > { %p880_p5 = scmp.ne.s32.totalorder %s1162_s14, %s879_s11  ;;  %p888_p0 = scmp.lt.s32.totalorder %s879_s11, %s879_s11 }
  0x39   : > { %p882_p7 = pnand %p880_p5, %p840_p13  ;;  %p889_p1 = por %p888_p0, %p887_p12 }
  0x3b   : > { %p883_p9 = pneg %p882_p7 }
  0x3d   : > { %p890_p4 = pnand %p889_p1, %p883_p9 }
  0x3f   : > { %893 = shalt.err (!%p890_p4)
}
  0x40   : > { %757 = dma.hbm_to_vmem [thread:$0]  (!%p1158_p11), %s1407_s3, 256, %s1162_s14, [#allocation6], %s1046_s10, %s1046_s10, %s1047_s13  }
  0x41   : > { %s39_s16 = sadd.s32 1, %s1038_s25  ;;  %s48_s17 = sadd.s32 1, %s1030_s23 }
  0x42   : > { %p41_p13 = scmp.ge.s32.totalorder %s39_s16, 2  ;;  %p55_p6 = scmp.ne.s32.totalorder %s1030_s23, %s1026_s22 }
  0x43   : > { %p56_p10 = scmp.eq.s32.totalorder %s1042_s26, 0  ;;  %p771_p3 = scmp.lt.s32.totalorder %s1042_s26, 2 }
  0x44   : > { %s1437_s16 = smov (%p41_p13, %s39_s16), 0  ;;  %p1226_p7 = por %p1131_p2, %p55_p6 }
  0x45   : > { %p57_p5 = por %p56_p10, %p55_p6  ;;  %s43_s18 = ssub.s32 %s1038_s25, %s1437_s16 }
  0x46   : > { %s1423_s12 = scalar_select %p1226_p7, 1, 0 }
  0x47   : > { %s257_s19 = sand.u32 1, %s1030_s23   ;;  %p46_p9 = scmp.eq.s32.totalorder %s43_s18, 0 }
  0x48   : > { %s679_s14 = sshll.u32 %s257_s19, 2  ;;  %s680_s10 = sshll.u32 %s1038_s25, 6 }
  0x49   : > { %s1235_s13 = scalar_select %p46_p9, %s1030_s23, %s48_s17  }
  0x4a   : > { %s1240_s28 = scalar_lea.hbm %s1404_s0, %s680_s10  ;;  %s261_s30 = scalar_lea.vmem [#allocation2], %s679_s14 }
  0x4b   : > { %s269_s11 = sshll.u32 %s261_s30, 4  ;;  %p1244_p2 = pnand %p771_p3, %p57_p5  ;;  %s1248_s11 = int_to_ptr.vmem [resolvable:$true] %s269_s11 }
  0x4c   : > { %s258_s15 = scalar_lea.sflag [#allocation3], %s257_s19  ;;  %s894_s17 = scalar_lea.hbm %s1240_s28, 64 }
  0x4d   : > { %p895_p11 = scmp.ne.s32.totalorder %s1240_s28, %s894_s17  ;;  %p896_p12 = pneg %p1244_p2 }
  0x4e   : > { %s899_s10 = scalar_lea.hbm %s1404_s0, 128  ;;  %p900_p4 = scmp.lt.u32.totalorder %s1240_s28, %s1404_s0 }
  0x4f   : > { %p897_p0 = pnand %p896_p12, %p895_p11  ;;  %p901_p13 = scmp.lt.u32.totalorder %s899_s10, %s894_s17 }
  0x50   : > { %p903_p10 = scmp.lt.u32.totalorder %s894_s17, %s1240_s28 }
  0x51   : > { %p898_p1 = pneg %p897_p0  ;;  %p902_p6 = por %p901_p13, %p900_p4 }
  0x53   : > { %p904_p3 = por %p903_p10, %p902_p6 }
  0x55   : > { %p905_p5 = pnand %p904_p3, %p898_p1 }
  0x57   : > { %908 = shalt.err (!%p905_p5)
}
  0x58   : > { %s909_s19 = scalar_lea.vmem %s1248_s11, 64  ;;  %s1048_s30 = smov [#allocation2]  }
  0x59   : > { %p910_p9 = scmp.ne.s32.totalorder %s1248_s11, %s909_s19  ;;  %s914_s18 = sshll.u32 %s1048_s30, 4  ;;  %s915_s18 = int_to_ptr.vmem [resolvable:$false] %s914_s18 }
  0x5a   : > { %s916_s14 = scalar_lea.vmem %s915_s18, 128  ;;  %p917_p7 = scmp.lt.s32.totalorder %s1248_s11, %s915_s18 }
  0x5b   : > { %p912_p11 = pnand %p910_p9, %p896_p12  ;;  %p918_p4 = scmp.lt.s32.totalorder %s916_s14, %s909_s19 }
  0x5d   : > { %p913_p0 = pneg %p912_p11  ;;  %p919_p13 = por %p918_p4, %p917_p7 }
  0x5f   : > { %p920_p6 = pnand %p919_p13, %p913_p0 }
  0x61   : > { %923 = shalt.err (!%p920_p6)
}
  0x62   : > { %761 = dma.hbm_to_vmem [thread:$0]  (!%p1244_p2), %s1240_s28, 64, %s1248_s11, %s258_s15  }
  0x63   : > { %278 = sbr.rel (%p1147_p8) target bundleno = 497 (0x1f1), region = 40  ;;  %s1278_s17 = sand.u32 (!%p1147_p8), 1, %s1026_s22  }
  0x64   : > { %s682_s10 = sshll.u32 (!%p1147_p8), %s1278_s17, 2  ;;  %s281_s20 = scalar_lea.sflag (!%p1147_p8), [#allocation3], %s1278_s17 }
  0x65   : > { %s284_s27 = scalar_lea.vmem (!%p1147_p8), [#allocation2], %s682_s10  ;;  %p1425_p7 = scmp.ne.s32.totalorder (!%p1147_p8), %s1418_s7, 0 }
  0x6a   : > { %1005 = dma.done.wait (%p1425_p7), %s281_s20, 64  }
  0x6b   : > { %1007 = vsyncadd (%p1425_p7), %s281_s20, 4294967232  ;;  %p1426_p12 = scmp.ne.s32.totalorder %s1416_s29, 0 }
  0x6d   : > { %1009 = dma.done.wait (%p1426_p12), [#allocation6], 512  }
  0x6e   : > { %1011 = vsyncadd (%p1426_p12), [#allocation6], 4294966784  ;;  %v1049_v0 = vmov 0.0   ;;  %vm1050_vm0 = vmmov 0   ;;  %v834_v1 = vld [vmem:[#allocation5] sm:$0xff]   ;;  %v835_v2 = vld [vmem:[#allocation7] sm:$0xff]  }
  0x6f   : > { %721 = vmatprep.subr.bf16.mxu0 %v1049_v0  ;;  %729 = vmatprep.subr.bf16.mxu1 %v1049_v0  ;;  %v836_v3 = vld [vmem:[#allocation5 + $0x8] sm:$0xff]   ;;  %v837_v4 = vld [vmem:[#allocation7 + $0x8] sm:$0xff]   ;;  %vm351_vm1 = vcmask 261120   ;;  %s685_s29 = sshll.u32 %s1278_s17, 4  ;;  %vm459_vm2 = vcmask 60416   ;;  %s1051_s15 = smov 112  }
  0x70   : > { %725 = vmatprep.mubr.msk.bf16.mxu0 %vm1050_vm0, %v1049_v0  ;;  %733 = vmatprep.mubr.msk.bf16.mxu1 %vm1050_vm0, %v1049_v0  ;;  %v327_v5 = vld [vmem:[%s284_s27] sm:$0xf]  ;;  %s1297_s8 = scalar_lea.vmem [#allocation8], %s685_s29  ;;  %s1052_s19 = smov 120  }
  0x71   : > { %722 = vmatpush3.bf16.msra.mxu0 %v834_v1  ;;  %730 = vmatpush3.bf16.msra.mxu1 %v835_v2  ;;  %v687_v6 = vld [vmem:[%s1406_s2] ss:$0 sm:$0xff]  ;;  %s325_s30 = scalar_lea.vmem [#allocation9], %s685_s29  ;;  %s1053_s18 = smov 104  }
  0x72   : > { %723 = vmatprep.subr.bf16.mxu0 %v1049_v0  ;;  %731 = vmatprep.subr.bf16.mxu1 %v1049_v0  ;;  %v691_v7 = vld [vmem:[%s1408_s4] ss:$0 sm:$0xff]  ;;  %s519_s14 = sshll.u32 %s1297_s8, 4  ;;  %s536_s10 = sshll.u32 %s325_s30, 4  ;;  %s1308_s14 = int_to_ptr.vmem [resolvable:$true] %s519_s14  ;;  %s1310_s10 = int_to_ptr.vmem [resolvable:$true] %s536_s10 }
  0x73   : > { %s713_s20 = sshll.u32 %s1034_s24, 8  ;;  %s500_s11 = scalar_lea.sflag [#allocation4], %s1278_s17 }
  0x74   : > { %s1317_s7 = scalar_lea.hbm %s1409_s5, %s713_s20  ;;  %s1322_s28 = scalar_lea.hbm %s1410_s6, %s713_s20 }
  0x75   : > { %724 = vmatpush3.bf16.msra.mxu0 %v836_v3  ;;  %732 = vmatpush3.bf16.msra.mxu1 %v837_v4  ;;  %p1427_p2 = scmp.ne.s32.totalorder %s1423_s12, 0 }
  0x78   : > { %726 = vmatmul.mubr.msk.bf16.vlgmr.msra.gmra.mrb[0].mxu0 %vm351_vm1, %v327_v5  ;;  %734 = vmatmul.mubr.msk.bf16.vlgmr.msra.gmra.mrb[0].mxu1 %vm351_vm1, %v327_v5 }
 0x14b   : > { %v389_v8 = vpop.f32.mrb[0].mxu0  ;;  %v452_v11 = vpop.f32.mrb[0].mxu1 }
 0x14c   : > { %v390_v9 = vadd.f32 %v687_v6, %v389_v8  ;;  %v727_v10 = vpop.f32.mrb[1].mxu0  ;;  %v453_v12 = vadd.f32 %v691_v7, %v452_v11  ;;  %v735_v14 = vpop.f32.mrb[1].mxu1 }
 0x14d   : > { %v392_v13 = vpop.f32.mrb[2].mxu0  ;;  %v455_v17 = vpop.f32.mrb[2].mxu1 }
 0x14e   : > { %v458_v15 = vpack.c.bf16 %v390_v9, %v390_v9  ;;  %v728_v16 = vpop.f32.mrb[3].mxu0  ;;  %v461_v18 = vpack.c.bf16 %v453_v12, %v453_v12  ;;  %v736_v19 = vpop.f32.mrb[3].mxu1 }
 0x150   : > { %460 = vst.msk [vmem:[%s1297_s8] sm:$0xf] %vm459_vm2, %v458_v15  ;;  %479 = vrot.lane.b32.xlu1 %v458_v15, %s1051_s15  ;;  %466 = vrot.lane.b32.xlu0 %v458_v15, %s1052_s19  ;;  %462 = vst.msk [vmem:[%s325_s30] sm:$0xf] %vm459_vm2, %v461_v18 }
 0x154   : > { %484 = vrot.lane.b32.xlu1 %v461_v18, %s1051_s15  ;;  %474 = vrot.lane.b32.xlu0 %v461_v18, %s1052_s19  ;;  %s924_s15 = scalar_lea.vmem %s1308_s14, 256  ;;  %s1054_s19 = smov [#allocation8]  }
 0x155   : > { %p925_p8 = scmp.ne.s32.totalorder %s1308_s14, %s924_s15 }
 0x157   : > { %p926_p1 = pnand %p925_p8, %p1427_p2 }
 0x158   : > { %494 = vrot.lane.b32.xlu1 %v461_v18, %s1053_s18  ;;  %489 = vrot.lane.b32.xlu0 %v458_v15, %s1053_s18  ;;  %s928_s18 = sshll.u32 %s1054_s19, 4  ;;  %s929_s18 = int_to_ptr.vmem [resolvable:$false] %s928_s18 }
 0x159   : > { %p927_p10 = pneg %p926_p1  ;;  %s930_s27 = scalar_lea.vmem %s929_s18, 512 }
 0x15a   : > { %p931_p3 = scmp.lt.s32.totalorder %s1308_s14, %s929_s18  ;;  %p932_p5 = scmp.lt.s32.totalorder %s930_s27, %s924_s15 }
 0x15c   : > { %p933_p9 = por %p932_p5, %p931_p3 }
 0x15e   : > { %p934_p11 = pnand %p933_p9, %p927_p10 }
 0x1c2   : > { %v480_v20 = vpop.permute.xlu1 %479  ;;  %v467_v21 = vpop.permute.xlu0 %466 }
 0x1c3   : > { %699 = vst.msk [vmem:[%s1297_s8 + $0x8] sm:$0xf] %vm459_vm2, %v480_v20  ;;  %696 = vst.msk [vmem:[%s1297_s8 + $0x4] sm:$0xf] %vm459_vm2, %v467_v21 }
 0x1c6   : > { %v485_v22 = vpop.permute.xlu1 %484  ;;  %v475_v23 = vpop.permute.xlu0 %474 }
 0x1c7   : > { %700 = vst.msk [vmem:[%s325_s30 + $0x8] sm:$0xf] %vm459_vm2, %v485_v22  ;;  %698 = vst.msk [vmem:[%s325_s30 + $0x4] sm:$0xf] %vm459_vm2, %v475_v23 }
 0x1ca   : > { %v495_v24 = vpop.permute.xlu1 %494  ;;  %v490_v25 = vpop.permute.xlu0 %489 }
 0x1cb   : > { %702 = vst.msk [vmem:[%s325_s30 + $0xc] sm:$0xf] %vm459_vm2, %v495_v24  ;;  %701 = vst.msk [vmem:[%s1297_s8 + $0xc] sm:$0xf] %vm459_vm2, %v490_v25 }
 0x1cc   : > { %937 = shalt.err (!%p934_p11)
}
 0x1cd   : > { %s938_s8 = scalar_lea.hbm %s1317_s7, 256  ;;  %s942_s29 = scalar_lea.hbm %s1409_s5, 512 }
 0x1ce   : > { %p939_p0 = scmp.ne.s32.totalorder %s1317_s7, %s938_s8  ;;  %p943_p6 = scmp.lt.u32.totalorder %s1317_s7, %s1409_s5 }
 0x1cf   : > { %p944_p7 = scmp.lt.u32.totalorder %s942_s29, %s938_s8  ;;  %p946_p8 = scmp.lt.u32.totalorder %s938_s8, %s1317_s7 }
 0x1d0   : > { %p940_p4 = pnand %p939_p0, %p1427_p2 }
 0x1d1   : > { %p945_p12 = por %p944_p7, %p943_p6 }
 0x1d2   : > { %p941_p13 = pneg %p940_p4 }
 0x1d3   : > { %p947_p1 = por %p946_p8, %p945_p12 }
 0x1d5   : > { %p948_p10 = pnand %p947_p1, %p941_p13 }
 0x1d7   : > { %951 = shalt.err (!%p948_p10)
}
 0x1d8   : > { %s1055_s15 = smov 64   ;;  %s1056_s19 = smov 4  }
 0x1d9   : > { %747 = dma.vmem_to_hbm [thread:$0]  (%p1427_p2), %s1308_s14, 256, %s1317_s7, %s500_s11, %s1055_s15, %s1055_s15, %s1056_s19  }
 0x1da   : > { %s505_s18 = scalar_lea.sflag [#allocation10], %s1278_s17  ;;  %s952_s27 = scalar_lea.vmem %s1310_s10, 256 }
 0x1db   : > { %p953_p3 = scmp.ne.s32.totalorder %s1310_s10, %s952_s27  ;;  %s1057_s8 = smov [#allocation9]  }
 0x1dc   : > { %s956_s30 = sshll.u32 %s1057_s8, 4  ;;  %s957_s30 = int_to_ptr.vmem [resolvable:$false] %s956_s30 }
 0x1dd   : > { %p954_p5 = pnand %p953_p3, %p1427_p2  ;;  %s958_s20 = scalar_lea.vmem %s957_s30, 512 }
 0x1de   : > { %p959_p11 = scmp.lt.s32.totalorder %s1310_s10, %s957_s30  ;;  %p960_p0 = scmp.lt.s32.totalorder %s958_s20, %s952_s27 }
 0x1df   : > { %p955_p9 = pneg %p954_p5 }
 0x1e0   : > { %p961_p4 = por %p960_p0, %p959_p11 }
 0x1e2   : > { %p962_p13 = pnand %p961_p4, %p955_p9 }
 0x1e4   : > { %965 = shalt.err (!%p962_p13)
}
 0x1e5   : > { %s966_s14 = scalar_lea.hbm %s1322_s28, 256  ;;  %s970_s29 = scalar_lea.hbm %s1410_s6, 512 }
 0x1e6   : > { %p967_p6 = scmp.ne.s32.totalorder %s1322_s28, %s966_s14  ;;  %p971_p8 = scmp.lt.u32.totalorder %s1322_s28, %s1410_s6 }
 0x1e7   : > { %p972_p1 = scmp.lt.u32.totalorder %s970_s29, %s966_s14  ;;  %p974_p3 = scmp.lt.u32.totalorder %s966_s14, %s1322_s28 }
 0x1e8   : > { %p968_p7 = pnand %p967_p6, %p1427_p2 }
 0x1e9   : > { %p973_p10 = por %p972_p1, %p971_p8 }
 0x1ea   : > { %p969_p12 = pneg %p968_p7 }
 0x1eb   : > { %p975_p5 = por %p974_p3, %p973_p10 }
 0x1ed   : > { %p976_p9 = pnand %p975_p5, %p969_p12 }
 0x1ef   : > { %979 = shalt.err (!%p976_p9)
}
 0x1f0   : > { %748 = dma.vmem_to_hbm [thread:$0]  (%p1427_p2), %s1310_s10, 256, %s1322_s28, %s505_s18, %s1055_s15, %s1055_s15, %s1056_s19  }
 0x1f1 PF: > { %s1428_s27 = sld [smem:[#allocation15_spill]]  ;;  %s551_s8 = sand.u32 1, %s1022_s21  }
 0x1f2   : > { %p1430_p0 = scmp.ge.s32.totalorder %s1042_s26, 2  ;;  %s552_s30 = scalar_lea.sflag [#allocation4], %s551_s8 }
 0x1f7   : > { %p1429_p11 = scmp.ne.s32.totalorder %s1428_s27, 0 }
 0x1f9   : > { %p763_p4 = pnand %p1430_p0, %p1429_p11 }
 0x1fb   : > { %1013 = dma.done.wait (!%p763_p4), %s552_s30, 256  }
 0x1fc   : > { %1015 = vsyncadd (!%p763_p4), %s552_s30, 4294967040  ;;  %s561_s12 = scalar_lea.sflag [#allocation10], %s551_s8 }
 0x1fd   : > { %1017 = dma.done.wait (!%p763_p4), %s561_s12, 256  }
 0x1fe   : > { %1019 = vsyncadd (!%p763_p4), %s561_s12, 4294967040  ;;  %s27_s26 = sadd.s32 1, %s1042_s26   ;;  %s1431_s21 = smov %s1026_s22 }
 0x1ff   : > { %p24_p13 = scmp.ge.s32.totalorder %s27_s26, 4   ;;  %s1432_s22 = smov %s1030_s23 }
 0x200   : > { %s1433_s23 = smov %s1235_s13  ;;  %s1434_s24 = smov %s1038_s25 }
 0x201   : > { %s1435_s25 = smov %s1437_s16  ;;  %26 = sbr.rel (!%p24_p13) target bundleno = 9 (0x9), region = 116 }
 0x208   :  { %566 = vsyncpa [#allocation3], 1 }
 0x209   :  { %568 = vsyncpa [#allocation3 + $0x1], 1 }
 0x20a   :  { %569 = vsyncpa [#allocation6], 1 }
 0x20b   :  { %570 = vsyncpa [#allocation4], 1 }
 0x20c   :  { %572 = vsyncpa [#allocation4 + $0x1], 1 }
 0x20d   :  { %573 = vsyncpa [#allocation10], 1 }
 0x20e   :  { %575 = vsyncpa [#allocation10 + $0x1], 1 }

</bundles_post_ra>
